<compile_context>
chip_gen: v6e
topology: v6e:2x2x1
jax: 0.10.0
libtpu: 0.0.40
codegen_flags: <defaults>
</compile_context>

<pallas_src>
import functools

import jax
import jax.numpy as jnp
from jax.experimental import pallas as pl
from jax.experimental.pallas import tpu as pltpu


def _round_up(x, m):
    return (x + m - 1) // m * m


# ----------------------------------------------------------------------------
# Kernel 1: per-row contrastive loss (fused distance + margin hinge)
# ----------------------------------------------------------------------------

def _row_loss_kernel(f1_ref, f2_ref, lab_ref, out_ref, acc_ref, *, margin):
    j = pl.program_id(1)

    @pl.when(j == 0)
    def _init():
        acc_ref[...] = jnp.zeros_like(acc_ref)

    # Partial sum of squared differences over this feature tile (f32 accum).
    d = f1_ref[...].astype(jnp.float32) - f2_ref[...].astype(jnp.float32)
    acc_ref[...] += jnp.sum(d * d, axis=1, keepdims=True)

    @pl.when(j == pl.num_programs(1) - 1)
    def _finalize():
        d2 = acc_ref[...]                       # squared euclidean distance
        dist = jnp.sqrt(d2)
        lab = lab_ref[...].astype(jnp.float32)
        hinge = jnp.maximum(margin - dist, 0.0)
        out_ref[...] = lab * d2 + (1.0 - lab) * hinge * hinge


# ----------------------------------------------------------------------------
# Kernel 2: mean over the (padded) per-row losses -> scalar
# ----------------------------------------------------------------------------

def _mean_kernel(loss_ref, out_ref, acc_ref, *, inv_n):
    i = pl.program_id(0)

    @pl.when(i == 0)
    def _init():
        acc_ref[...] = jnp.zeros_like(acc_ref)

    acc_ref[...] += jnp.sum(loss_ref[...], axis=0, keepdims=True)

    @pl.when(i == pl.num_programs(0) - 1)
    def _finalize():
        out_ref[...] = acc_ref[...] * inv_n


# ----------------------------------------------------------------------------
# Wrapper
# ----------------------------------------------------------------------------

def contrastive_loss(feat1, feat2, label, margin=1.0):
    """ContrastiveLoss.forward(feat1, feat2, label) -> scalar mean loss."""
    assert feat1.shape == feat2.shape and feat1.ndim == 2
    n, d = feat1.shape
    assert label.shape[0] == n

    # --- tiling ---------------------------------------------------------
    d_pad = _round_up(d, 128)                                # lane-dense
    td = next(t for t in (1024, 512, 256, 128) if d_pad % t == 0)
    tm = min(512, _round_up(n, 8))                           # sublane multiple
    n_pad = _round_up(n, tm)
    # Per-block bytes <= 512*1024*4 = 2 MiB -> double-buffered inputs fit
    # comfortably under the 32 MiB scoped VMEM default on v5e/v6e/v7x.

    # --- padding (padded rows: zero features + label 1.0 => zero loss) ---
    f1 = jnp.pad(feat1, ((0, n_pad - n), (0, d_pad - d)))
    f2 = jnp.pad(feat2, ((0, n_pad - n), (0, d_pad - d)))
    lab = jnp.pad(label.astype(jnp.float32).reshape(n, 1),
                  ((0, n_pad - n), (0, 0)), constant_values=1.0)

    m_tiles = n_pad // tm
    d_tiles = d_pad // td

    per_row = pl.pallas_call(
        functools.partial(_row_loss_kernel, margin=float(margin)),
        out_shape=jax.ShapeDtypeStruct((n_pad, 1), jnp.float32),
        grid_spec=pltpu.PrefetchScalarGridSpec(
            num_scalar_prefetch=0,
            grid=(m_tiles, d_tiles),
            in_specs=[
                pl.BlockSpec((tm, td), lambda i, j: (i, j)),   # feat1 tile
                pl.BlockSpec((tm, td), lambda i, j: (i, j)),   # feat2 tile
                pl.BlockSpec((tm, 1), lambda i, j: (i, 0)),    # labels
            ],
            out_specs=pl.BlockSpec((tm, 1), lambda i, j: (i, 0)),
            scratch_shapes=[pltpu.VMEM((tm, 1), jnp.float32)],
        ),
        compiler_params=pltpu.CompilerParams(
            dimension_semantics=("parallel", "arbitrary"),
            vmem_limit_bytes=32 * 1024 * 1024,
        ),
    )(f1, f2, lab)

    total = pl.pallas_call(
        functools.partial(_mean_kernel, inv_n=1.0 / float(n)),
        out_shape=jax.ShapeDtypeStruct((1, 1), jnp.float32),
        grid_spec=pltpu.PrefetchScalarGridSpec(
            num_scalar_prefetch=0,
            grid=(m_tiles,),
            in_specs=[pl.BlockSpec((tm, 1), lambda i: (i, 0))],
            out_specs=pl.BlockSpec((1, 1), lambda i: (0, 0)),
            scratch_shapes=[pltpu.VMEM((1, 1), jnp.float32)],
        ),
        compiler_params=pltpu.CompilerParams(
            dimension_semantics=("arbitrary",),
        ),
    )(per_row)

    return total[0, 0]


# ----------------------------------------------------------------------------
# Demo
# ----------------------------------------------------------------------------

if __name__ == "__main__":
    key = jax.random.PRNGKey(0)
    k1, k2, k3 = jax.random.split(key, 3)

    # Small shapes consistent with the module's usage (Siamese feature pairs).
    n, d = 4, 1280
    feat1 = jax.random.normal(k1, (n, d), jnp.float32)
    feat2 = jax.random.normal(k2, (n, d), jnp.float32)
    label = (jax.random.uniform(k3, (n,)) > 0.5).astype(jnp.float32)
    margin = 1.0

    loss = contrastive_loss(feat1, feat2, label, margin=margin)
    loss = jax.block_until_ready(loss)

    # Pure-JAX reference (mirrors the PyTorch module).
    dist_ref = jnp.sqrt(jnp.sum((feat1 - feat2) ** 2, axis=1))
    loss_ref = jnp.mean(label * dist_ref ** 2
                        + (1.0 - label) * jnp.maximum(margin - dist_ref, 0.0) ** 2)

    assert loss.shape == ()
    assert bool(jnp.isfinite(loss))
    assert bool(jnp.allclose(loss, loss_ref, rtol=1e-5, atol=1e-5)), (loss, loss_ref)
    print("KERNEL_OK")
</pallas_src>

<mosaic_0001>
module attributes {stable_mosaic.version = 11 : i64} {
  func.func @_row_loss_kernel(%arg0: i32, %arg1: i32, %arg2: memref<8x256xf32, #tpu.memory_space<vmem>>, %arg3: memref<8x256xf32, #tpu.memory_space<vmem>>, %arg4: memref<8x1xf32, #tpu.memory_space<vmem>>, %arg5: memref<8x1xf32, #tpu.memory_space<vmem>>, %arg6: memref<8x1xf32, #tpu.memory_space<vmem>>) attributes {dimension_semantics = [#tpu.dimension_semantics<parallel>, #tpu.dimension_semantics<arbitrary>], iteration_bounds = array<i64: 1, 5>, scalar_prefetch = 0 : i64, scratch_operands = 1 : i64, tpu.core_type = #tpu.core_type<tc>, window_params = [{transform_indices = @transform_0, window_bounds = array<i64: 8, 256>}, {transform_indices = @transform_1, window_bounds = array<i64: 8, 256>}, {transform_indices = @transform_2, window_bounds = array<i64: 8, 1>}, {transform_indices = @transform_3, window_bounds = array<i64: 8, 1>}]} {
    %c0_i32 = arith.constant 0 : i32
    %0 = arith.cmpi eq, %arg1, %c0_i32 : i32
    %1 = arith.extui %0 : i1 to i32
    %c0_i32_0 = arith.constant 0 : i32
    %2 = arith.cmpi ne, %1, %c0_i32_0 : i32
    scf.if %2 {
      %cst_9 = arith.constant 0.000000e+00 : f32
      %15 = vector.broadcast %cst_9 : f32 to vector<8x1xf32>
      %c0_10 = arith.constant 0 : index
      %c0_11 = arith.constant 0 : index
      %16 = vector.load %arg6[%c0_10, %c0_11] : memref<8x1xf32, #tpu.memory_space<vmem>>, vector<8x1xf32>
      tpu.vector_store %arg6[%c0_10, %c0_11], %15 {strides = array<i32>} : memref<8x1xf32, #tpu.memory_space<vmem>>, vector<8x1xf32>,
    } else {
    }
    %c0 = arith.constant 0 : index
    %c0_1 = arith.constant 0 : index
    %3 = vector.load %arg2[%c0, %c0_1] : memref<8x256xf32, #tpu.memory_space<vmem>>, vector<8x256xf32>
    %c0_2 = arith.constant 0 : index
    %c0_3 = arith.constant 0 : index
    %4 = vector.load %arg3[%c0_2, %c0_3] : memref<8x256xf32, #tpu.memory_space<vmem>>, vector<8x256xf32>
    %5 = arith.subf %3, %4 : vector<8x256xf32>
    %c0_4 = arith.constant 0 : index
    %c0_5 = arith.constant 0 : index
    %6 = vector.load %arg6[%c0_4, %c0_5] : memref<8x1xf32, #tpu.memory_space<vmem>>, vector<8x1xf32>
    %7 = arith.mulf %5, %5 : vector<8x256xf32>
    %cst = arith.constant dense<0.000000e+00> : vector<8xf32>
    %8 = vector.multi_reduction <add>, %7, %cst [1] : vector<8x256xf32> to vector<8xf32>
    %9 = vector.shape_cast %8 : vector<8xf32> to vector<8x1xf32>
    %10 = arith.addf %6, %9 : vector<8x1xf32>
    %c0_6 = arith.constant 0 : index
    %c0_7 = arith.constant 0 : index
    %11 = vector.load %arg6[%c0_6, %c0_7] : memref<8x1xf32, #tpu.memory_space<vmem>>, vector<8x1xf32>
    tpu.vector_store %arg6[%c0_6, %c0_7], %10 {strides = array<i32>} : memref<8x1xf32, #tpu.memory_space<vmem>>, vector<8x1xf32>,
    %c4_i32 = arith.constant 4 : i32
    %12 = arith.cmpi eq, %arg1, %c4_i32 : i32
    %13 = arith.extui %12 : i1 to i32
    %c0_i32_8 = arith.constant 0 : i32
    %14 = arith.cmpi ne, %13, %c0_i32_8 : i32
    scf.if %14 {
      %c0_9 = arith.constant 0 : index
      %c0_10 = arith.constant 0 : index
      %15 = vector.load %arg6[%c0_9, %c0_10] : memref<8x1xf32, #tpu.memory_space<vmem>>, vector<8x1xf32>
      %16 = math.sqrt %15 : vector<8x1xf32>
      %c0_11 = arith.constant 0 : index
      %c0_12 = arith.constant 0 : index
      %17 = vector.load %arg4[%c0_11, %c0_12] : memref<8x1xf32, #tpu.memory_space<vmem>>, vector<8x1xf32>
      %cst_13 = arith.constant 1.000000e+00 : f32
      %18 = vector.broadcast %cst_13 : f32 to vector<8x1xf32>
      %19 = arith.subf %18, %16 : vector<8x1xf32>
      %cst_14 = arith.constant 0.000000e+00 : f32
      %20 = vector.broadcast %cst_14 : f32 to vector<8x1xf32>
      %21 = arith.maximumf %19, %20 : vector<8x1xf32>
      %22 = arith.mulf %17, %15 : vector<8x1xf32>
      %cst_15 = arith.constant 1.000000e+00 : f32
      %23 = vector.broadcast %cst_15 : f32 to vector<8x1xf32>
      %24 = arith.subf %23, %17 : vector<8x1xf32>
      %25 = arith.mulf %24, %21 : vector<8x1xf32>
      %26 = arith.mulf %25, %21 : vector<8x1xf32>
      %27 = arith.addf %22, %26 : vector<8x1xf32>
      %c0_16 = arith.constant 0 : index
      %c0_17 = arith.constant 0 : index
      %28 = vector.load %arg5[%c0_16, %c0_17] : memref<8x1xf32, #tpu.memory_space<vmem>>, vector<8x1xf32>
      tpu.vector_store %arg5[%c0_16, %c0_17], %27 {strides = array<i32>} : memref<8x1xf32, #tpu.memory_space<vmem>>, vector<8x1xf32>,
    } else {
    }
    return
  }
  func.func @transform_0(%arg0: i32, %arg1: i32) -> (i32, i32) {
    %c0_i32 = arith.constant 0 : i32
    return %arg0, %arg1 : i32, i32
  }
  func.func @transform_1(%arg0: i32, %arg1: i32) -> (i32, i32) {
    %c0_i32 = arith.constant 0 : i32
    return %arg0, %arg1 : i32, i32
  }
  func.func @transform_2(%arg0: i32, %arg1: i32) -> (i32, i32) {
    %c0_i32 = arith.constant 0 : i32
    %c0_i32_0 = arith.constant 0 : i32
    return %arg0, %c0_i32 : i32, i32
  }
  func.func @transform_3(%arg0: i32, %arg1: i32) -> (i32, i32) {
    %c0_i32 = arith.constant 0 : i32
    %c0_i32_0 = arith.constant 0 : i32
    return %arg0, %c0_i32 : i32, i32
  }
}

</mosaic_0001>

<bundles_post_ra>
// kernel: tpu_custom_call.1
= control target key start
LH: loop header
LB: loop body
LE: loop exit
PB: predicated region body
PF: predicated region fallthrough
CT: control target
= control target key end

     0   :  { %8 = vsyncpa [#allocation4], 0  ;;  %s769_s0 = inlined_call_operand.hbm [shape: f32[8,1280], index: 0, kind: input, shape index: {}]   ;;  %s770_s1 = inlined_call_operand.hbm [shape: f32[8,1280], index: 1, kind: input, shape index: {}]   ;;  %s771_s2 = inlined_call_operand.vmem [shape: f32[8,1], index: 2, kind: input, shape index: {}]   ;;  %s772_s3 = inlined_call_operand.vmem [shape: f32[8,1], index: 3, kind: output, shape index: {}]  }
   0x1   :  { %10 = vsyncpa [#allocation4 + $0x1], 0 }
   0x2   :  { %11 = vsyncpa [#allocation6], 0 }
   0x3   :  { %13 = vsyncpa [#allocation6 + $0x1], 0  ;;  %s638_s12 = smov 0   ;;  %s640_s13 = smov 0  }
   0x4   :  { %s642_s14 = smov 0   ;;  %s644_s15 = smov 0  }
   0x5   :  { %s646_s16 = smov 0   ;;  %s648_s17 = smov 0  }
   0x6 LB: > { %s420_s18 = sadd.s32 4294967295, %s613_s17   ;;  %s28_s19 = sadd.s32 1, %s609_s16  ;;  %s613_s17 = sphi %s648_s17, %s19_s17   ;;  %s609_s16 = sphi %s646_s16, %s781_s16   ;;  %s605_s15 = sphi %s644_s15, %s780_s15   ;;  %s601_s14 = sphi %s642_s14, %s779_s14   ;;  %s597_s13 = sphi %s640_s13, %s778_s13   ;;  %s593_s12 = sphi %s638_s12, %s777_s12  }
   0x7   : > { %p29_p0 = scmp.ge.s32.totalorder %s28_s19, 5  ;;  %s40_s20 = sadd.s32 1, %s601_s14 }
   0x8   : > { %p47_p1 = scmp.ne.s32.totalorder %s601_s14, %s597_s13  ;;  %p48_p2 = scmp.eq.s32.totalorder %s613_s17, 0 }
   0x9   : > { %s783_s19 = smov (%p29_p0, %s28_s19), 0  ;;  %p53_p4 = scmp.ne.s32.totalorder %s597_s13, %s593_s12 }
   0xa   : > { %p674_p3 = por %p48_p2, %p47_p1  ;;  %s36_s22 = ssub.s32 %s609_s16, %s783_s19 }
   0xb   : > { %p54_p5 = scmp.eq.s32.totalorder %s420_s18, 0  ;;  %p38_p6 = scmp.eq.s32.totalorder %s36_s22, 0 }
   0xc   : > { %p451_p8 = scmp.lt.s32.totalorder %s613_s17, 5  ;;  %s690_s25 = sand.u32 1, %s601_s14  }
   0xd   : > { %p681_p7 = por %p54_p5, %p53_p4  ;;  %s438_s26 = sshll.u32 %s609_s16, 8 }
   0xe   : > { %s687_s24 = scalar_select %p38_p6, %s601_s14, %s40_s20  }
   0xf   : > { %s424_s27 = sshll.u32 %s690_s25, 4  ;;  %s176_s30 = scalar_lea.hbm %s769_s0, %s438_s26 }
  0x10   : > { %s168_s4 = scalar_lea.vmem [#allocation3], %s424_s27  ;;  %p699_p9 = pnand %p451_p8, %p674_p3 }
  0x11   : > { %s178_s5 = sshll.u32 %s168_s4, 4  ;;  %p430_p10 = scmp.ge.s32.totalorder %s613_s17, 1  ;;  %s179_s5 = int_to_ptr.vmem [resolvable:$true] %s178_s5 }
  0x12   : > { %p204_p11 = scmp.lt.s32.totalorder %s613_s17, 6  ;;  %s165_s7 = scalar_lea.sflag [#allocation4], %s690_s25 }
  0x13   : > { %p505_p12 = pneg %p699_p9  ;;  %s516_s8 = scalar_lea.vmem %s179_s5, 256 }
  0x14   : > { %p517_p13 = scmp.ne.s32.totalorder %s179_s5, %s516_s8  ;;  %s615_s9 = smov [#allocation3]  }
  0x15   : > { %s521_s10 = sshll.u32 %s615_s9, 4  ;;  %s522_s10 = int_to_ptr.vmem [resolvable:$false] %s521_s10 }
  0x16   : > { %p519_p0 = pnand %p517_p13, %p505_p12  ;;  %s523_s11 = scalar_lea.vmem %s522_s10, 512 }
  0x17   : > { %p524_p2 = scmp.lt.s32.totalorder %s179_s5, %s522_s10  ;;  %p525_p3 = scmp.lt.s32.totalorder %s523_s11, %s516_s8 }
  0x18   : > { %p520_p1 = pneg %p519_p0 }
  0x19   : > { %p526_p4 = por %p525_p3, %p524_p2 }
  0x1b   : > { %p527_p5 = pnand %p526_p4, %p520_p1 }
  0x1d   : > { %530 = shalt.err (!%p527_p5)
}
  0x1e   : > { %447 = dma.hbm_to_vmem [thread:$0]  (!%p699_p9), %s176_s30, 256, %s179_s5, %s165_s7  }
  0x1f   : > { %p717_p6 = pnand %p430_p10, %p204_p11  ;;  %s197_s21 = scalar_lea.hbm %s770_s1, %s438_s26 }
  0x20   : > { %s189_s22 = scalar_lea.vmem [#allocation5], %s424_s27  ;;  %s186_s29 = scalar_lea.sflag [#allocation6], %s690_s25 }
  0x21   : > { %s199_s28 = sshll.u32 %s189_s22, 4  ;;  %s616_s30 = smov [#allocation5]   ;;  %s200_s28 = int_to_ptr.vmem [resolvable:$true] %s199_s28 }
  0x22   : > { %s544_s4 = scalar_lea.vmem %s200_s28, 256  ;;  %s549_s5 = sshll.u32 %s616_s30, 4  ;;  %s550_s5 = int_to_ptr.vmem [resolvable:$false] %s549_s5 }
  0x23   : > { %p545_p8 = scmp.ne.s32.totalorder %s200_s28, %s544_s4  ;;  %s551_s7 = scalar_lea.vmem %s550_s5, 512 }
  0x24   : > { %p552_p10 = scmp.lt.s32.totalorder %s200_s28, %s550_s5  ;;  %p553_p11 = scmp.lt.s32.totalorder %s551_s7, %s544_s4 }
  0x25   : > { %p547_p13 = pnand %p545_p8, %p505_p12 }
  0x26   : > { %p554_p1 = por %p553_p11, %p552_p10 }
  0x27   : > { %p548_p0 = pneg %p547_p13 }
  0x29   : > { %p555_p2 = pnand %p554_p1, %p548_p0 }
  0x2b   : > { %558 = shalt.err (!%p555_p2)
}
  0x2c   : > { %450 = dma.hbm_to_vmem [thread:$0]  (!%p699_p9), %s197_s21, 256, %s200_s28, %s186_s29  }
  0x2d   : > { %208 = sbr.rel (%p717_p6) target bundleno = 247 (0xf7), region = 32  ;;  %s210_s25 = sand.u32 (!%p717_p6), 1, %s597_s13  }
  0x2e   : > { %s431_s26 = sshll.u32 (!%p717_p6), %s210_s25, 4  ;;  %s211_s27 = scalar_lea.sflag (!%p717_p6), [#allocation4], %s210_s25 }
  0x2f   : > { %s214_s8 = scalar_lea.vmem (!%p717_p6), [#allocation3], %s431_s26 }
  0x32   : > { %584 = dma.done.wait (%p681_p7), %s211_s27, 256  }
  0x33   : > { %586 = vsyncadd (%p681_p7), %s211_s27, 4294967040  ;;  %s220_s9 = scalar_lea.sflag [#allocation6], %s210_s25  ;;  %s223_s10 = scalar_lea.vmem [#allocation5], %s431_s26 }
  0x34   : > { %588 = dma.done.wait (%p681_p7), %s220_s9, 256  }
  0x35   : > { %590 = vsyncadd (%p681_p7), %s220_s9, 4294967040  ;;  %p433_p9 = scmp.ne.s32.totalorder %s605_s15, 0 }
  0x37   : > { %267 = sbr.rel (%p433_p9) target bundleno = 62 (0x3e), region = 44 }
  0x3c   : > { %vm268_vm0 = vcmask 7168   ;;  %v617_v0 = vmov 0.0  }
  0x3d   : > { %269 = vst.msk [vmem:[#allocation2] sm:$0xff] %vm268_vm0, %v617_v0 }
  0x3e PF: > { %v270_v1 = vld [vmem:[%s214_s8] sm:$0xff]  ;;  %v271_v2 = vld [vmem:[%s214_s8 + $0x8] sm:$0xff]  ;;  %vm283_vm1 = vcmask 7168   ;;  %p434_p7 = scmp.ne.s32.totalorder %s605_s15, 4 }
  0x3f   : > { %v272_v3 = vld [vmem:[%s223_s10] sm:$0xff]  ;;  %v273_v4 = vld [vmem:[%s223_s10 + $0x8] sm:$0xff] }
  0x40   : > { %v274_v5 = vsub.f32 %v270_v1, %v272_v3  ;;  %v275_v6 = vsub.f32 %v271_v2, %v273_v4 }
  0x42   : > { %v277_v7 = vmul.f32 %v274_v5, %v274_v5  ;;  %v278_v8 = vmul.f32 %v275_v6, %v275_v6 }
  0x44   : > { %v279_v9 = vadd.f32 %v278_v8, %v277_v7  ;;  %v276_v10 = vld [vmem:[#allocation2] sm:$0xff] }
  0x46   : > { %280 = vadd.xlane.f32.xlu0 %v279_v9 }
  0xce   : > { %288 = sbr.rel (%p434_p7) target bundleno = 247 (0xf7), region = 48 }
  0xcf   : > { %v281_v11 = vpop.xlane.xlu0 %280 }
  0xd0   : > { %v282_v12 = vadd.f32 %v281_v11, %v276_v10 }
  0xd2   : > { %284 = vst.msk [vmem:[#allocation2] sm:$0xff] %vm283_vm1, %v282_v12 }
  0xd3   : > { %v297_v17 = vld [vmem:[%s771_s2] sm:$0xff] }
  0xd4   : > { %v301_v21 = vsub.f32 1.0, %v297_v17 }
  0xd9   : > { %v289_v13 = vld [vmem:[#allocation2] sm:$0xff] }
  0xda   : > { %501 = vrsqrt.f32 %v289_v13  ;;  %vm292_vm2 = vcmp.eq.f32.partialorder %v289_v13, inf  ;;  %v295_v15 = vand.u32 2147483648, %v289_v13  ;;  %vm294_vm3 = vcmp.eq.f32.partialorder %v289_v13, 0.0 }
  0xdb   : > { %v300_v23 = vmul.f32 %v297_v17, %v289_v13 }
  0xe7   : > { %v502_v14 = vpop.eup %501 }
  0xe8   : > { %v291_v16 = vmul.f32 %v502_v14, %v289_v13 }
  0xea   : > { %v293_v18 = vsel %vm292_vm2, %v289_v13, %v291_v16 }
  0xeb   : > { %v296_v19 = vsel %vm294_vm3, %v295_v15, %v293_v18 }
  0xec   : > { %v298_v20 = vsub.f32 1.0, %v296_v19 }
  0xee   : > { %v299_v22 = vmax.f32 %v298_v20, 0.0 }
  0xf0   : > { %v302_v24 = vmul.f32 %v301_v21, %v299_v22 }
  0xf2   : > { %v303_v25 = vmul.f32 %v302_v24, %v299_v22 }
  0xf4   : > { %v304_v26 = vadd.f32 %v303_v25, %v300_v23 }
  0xf6   : > { %305 = vst.msk [vmem:[%s772_s3] sm:$0xff] %vm283_vm1, %v304_v26 }
  0xf7 PF: > { %s19_s17 = sadd.s32 1, %s613_s17   ;;  %s777_s12 = smov %s597_s13 }
  0xf8   : > { %p16_p12 = scmp.ge.s32.totalorder %s19_s17, 7   ;;  %s778_s13 = smov %s601_s14 }
  0xf9   : > { %s779_s14 = smov %s687_s24  ;;  %s780_s15 = smov %s609_s16 }
  0xfa   : > { %s781_s16 = smov %s783_s19  ;;  %18 = sbr.rel (!%p16_p12) target bundleno = 6 (0x6), region = 96 }
  0xff   :  { %325 = vsyncpa [#allocation4], 1 }
 0x100   :  { %327 = vsyncpa [#allocation4 + $0x1], 1 }
 0x101   :  { %328 = vsyncpa [#allocation6], 1 }
 0x102   :  { %330 = vsyncpa [#allocation6 + $0x1], 1 }

</bundles_post_ra>
